<compile_context>
chip_gen: v7x
topology: tpu7x:2x2x1
jax: 0.10.0
libtpu: 0.0.40
codegen_flags: <defaults>
</compile_context>

<pallas_src>
import math
import jax
import jax.numpy as jnp
from jax import lax
from jax.experimental import pallas as pl
from jax.experimental.pallas import tpu as pltpu


def _round_up(n, m):
    return ((n + m - 1) // m) * m


def _largest_divisor_leq(n, cap):
    for d in range(min(n, cap), 0, -1):
        if n % d == 0:
            return d
    return 1


# -------------------------------------------------------------------- kernels
def xproj_kernel(x_ref, w_ref, b_ref, o_ref):
    """Fused input projection: (TM, I) x (I, 3*Hp) + bias, one tile per step."""
    o_ref[...] = (
        jnp.dot(x_ref[...].astype(w_ref.dtype), w_ref[...],
                preferred_element_type=jnp.float32)
        + b_ref[...]
    ).astype(o_ref.dtype)


def gru_rec_kernel(xg_ref, h0_ref, wh_ref, wn_ref, out_ref, h_scr):
    """Recurrent part only. One grid step = CT timesteps for one batch tile.

    grid = (B//BT, T//CT); axis 0 is a parallel batch-tile axis, axis 1 is the
    sequential time-chunk axis.  Wh/Wn are resident (constant index_map), the
    hidden state is carried across time chunks in the f32 VMEM scratch.
    """
    tc = pl.program_id(1)                       # time-chunk index (inner, "arbitrary")

    @pl.when(tc == 0)
    def _():                                     # (re)load h0 at start of each batch tile
        h_scr[...] = h0_ref[...].astype(jnp.float32)

    Hp = h_scr.shape[1]
    CT = xg_ref.shape[0]
    wdt = wh_ref.dtype                           # dtype fed to the MXU
    wh = wh_ref[...]                             # (Hp, 2*Hp) resident
    wn = wn_ref[...]                             # (Hp,   Hp) resident

    def step(i, h):
        xg = xg_ref[i]                           # (BT, 3*Hp) precomputed x-gates (+bias)
        hg = jnp.dot(h.astype(wdt), wh, preferred_element_type=jnp.float32)
        zt = jax.nn.sigmoid(xg[:, :Hp] + hg[:, :Hp])
        rt = jnp.tanh(xg[:, Hp:2 * Hp] + hg[:, Hp:2 * Hp])
        n = jnp.tanh(xg[:, 2 * Hp:]
                     + jnp.dot((rt * h).astype(wdt), wn,
                               preferred_element_type=jnp.float32))
        hy = h + zt * (n - h)                    # == (1 - zt) * h + zt * n
        out_ref[i] = hy.astype(out_ref.dtype)
        return hy

    h_scr[...] = lax.fori_loop(0, CT, step, h_scr[...], unroll=True)


# --------------------------------------------------------------------- params
def init_params(key, input_size, hidden_size):
    """Deterministic init matching reset_parameters: U(-1/sqrt(H), 1/sqrt(H))."""
    std = 1.0 / math.sqrt(hidden_size)
    params = {}
    layer_in = {"x2h": input_size, "h2h": hidden_size,
                "x2r": input_size, "h2r": hidden_size,
                "x2n": input_size, "h2n": hidden_size}
    for name, in_dim in layer_in.items():
        key, kw, kb = jax.random.split(key, 3)
        W = jax.random.uniform(kw, (hidden_size, in_dim), jnp.float32, -std, std)
        b = jax.random.uniform(kb, (hidden_size,), jnp.float32, -std, std)
        params[name] = (W, b)
    return params


def prepare_gru_params(params, input_size, hidden_size, dtype=jnp.float32):
    """One-time packing: transpose, pad the *output* (lane) dim to 128, fuse gates.

    dtype=jnp.bfloat16 halves weight VMEM/DMA and runs the MXU at full rate
    (accumulation stays f32); default f32 keeps bit-faithful numerics.
    The input (K) dims are NOT padded: I and H only need lane padding on the
    weight's output dimension.
    """
    H, I = hidden_size, input_size
    Hp = _round_up(H, 128)

    def pad_cols(W, cols):                       # (out,in) -> (in, cols): col-pad only
        Wt = W.T
        return jnp.pad(Wt, ((0, 0), (0, cols - Wt.shape[1])))

    def pad_rows_cols(W, rows, cols):            # (out,in) -> (rows, cols)
        Wt = W.T
        return jnp.pad(Wt, ((0, rows - Wt.shape[0]), (0, cols - Wt.shape[1])))

    def pad_b(b, cols):
        return jnp.pad(b, (0, cols - b.shape[0]))

    wx = jnp.concatenate([pad_cols(params["x2h"][0], Hp),
                          pad_cols(params["x2r"][0], Hp),
                          pad_cols(params["x2n"][0], Hp)], axis=1)          # (I, 3Hp)
    wh = jnp.concatenate([pad_rows_cols(params["h2h"][0], Hp, Hp),
                          pad_rows_cols(params["h2r"][0], Hp, Hp)], axis=1)  # (Hp, 2Hp)
    wn = pad_rows_cols(params["h2n"][0], Hp, Hp)                             # (Hp, Hp)
    b = jnp.concatenate([pad_b(params["x2h"][1] + params["h2h"][1], Hp),
                         pad_b(params["x2r"][1] + params["h2r"][1], Hp),
                         pad_b(params["x2n"][1] + params["h2n"][1], Hp)])[None, :]

    return {"wx": wx.astype(dtype), "wh": wh.astype(dtype), "wn": wn.astype(dtype),
            "b": b.astype(jnp.float32), "H": H, "I": I, "Hp": Hp}


# ------------------------------------------------------------------- wrappers
def input_projection(xs, packed, tile_m=256):
    """xg[t,b,:] = xs[t,b,:] @ [Wx2h|Wx2r|Wx2n] + fused_bias  -> (T, B, 3*Hp) f32.

    Time-independent, so it is done as one large lane-dense matmul outside the
    recurrence (full MXU row utilization, no per-step bias/cast work).
    """
    T, B, I = xs.shape
    Hp = packed["Hp"]
    M = T * B
    Mp = _round_up(M, 8)
    x2d = xs.reshape(M, I)
    if Mp != M:
        x2d = jnp.pad(x2d, ((0, Mp - M), (0, 0)))
    tm = min(_round_up(tile_m, 8), Mp)
    while Mp % tm:                               # make tm divide Mp (both multiples of 8)
        tm -= 8

    xg = pl.pallas_call(
        xproj_kernel,
        out_shape=jax.ShapeDtypeStruct((Mp, 3 * Hp), jnp.float32),
        grid=(Mp // tm,),
        in_specs=[
            pl.BlockSpec((tm, I), lambda m: (m, 0)),          # xs rows streamed
            pl.BlockSpec((I, 3 * Hp), lambda m: (0, 0)),      # fused x-weights resident
            pl.BlockSpec((1, 3 * Hp), lambda m: (0, 0)),      # fused biases resident
        ],
        out_specs=pl.BlockSpec((tm, 3 * Hp), lambda m: (m, 0)),
        compiler_params=pltpu.CompilerParams(dimension_semantics=("parallel",)),
    )(x2d, packed["wx"], packed["b"])

    if Mp != M:
        xg = xg[:M]
    return xg.reshape(T, B, 3 * Hp)


def gru_sequence(xs, h0, packed, *, chunk_t=16, batch_tile=None, trim=True,
                 out_dtype=None, vmem_limit_bytes=None):
    """Run T GRUCell steps. xs: (T,B,I), h0: (B,H) -> (T,B,H) (or (T,B,Hp) if trim=False)."""
    T, B, I = xs.shape
    H, Hp = packed["H"], packed["Hp"]
    out_dtype = out_dtype or h0.dtype

    xg = input_projection(xs, packed)            # (T, B, 3*Hp) f32, off the critical path
    h0_p = jnp.pad(h0, ((0, 0), (0, Hp - H)))    # padded lanes stay exactly 0 in the loop

    CT = _largest_divisor_leq(T, chunk_t)        # timesteps per grid step
    if batch_tile is None:
        BT = B
    else:
        BT = batch_tile
        assert B % BT == 0 and (BT % 8 == 0 or BT == B)
    NB, NT = B // BT, T // CT

    out = pl.pallas_call(
        gru_rec_kernel,
        out_shape=jax.ShapeDtypeStruct((T, B, Hp), out_dtype),
        grid=(NB, NT),
        in_specs=[
            pl.BlockSpec((CT, BT, 3 * Hp), lambda b, t: (t, b, 0)),  # precomputed x-gates
            pl.BlockSpec((BT, Hp), lambda b, t: (b, 0)),             # h0 per batch tile
            pl.BlockSpec((Hp, 2 * Hp), lambda b, t: (0, 0)),         # fused h weights (resident)
            pl.BlockSpec((Hp, Hp), lambda b, t: (0, 0)),             # h2n weights (resident)
        ],
        out_specs=pl.BlockSpec((CT, BT, Hp), lambda b, t: (t, b, 0)),
        scratch_shapes=[pltpu.VMEM((BT, Hp), jnp.float32)],          # hidden-state carry
        compiler_params=pltpu.CompilerParams(
            dimension_semantics=("parallel", "arbitrary"),           # T is a carry axis
            vmem_limit_bytes=vmem_limit_bytes),
    )(xg, h0_p, packed["wh"], packed["wn"])

    if trim:
        out = out[:, :, :H]
    return out


def gru_cell(x, hx, packed):
    """Single GRUCell forward step (matches the PyTorch module's forward)."""
    return gru_sequence(x[None], hx, packed, trim=True)[0]


# ------------------------------------------------------------------ reference
def gru_cell_ref(x, hx, params):
    def linear(v, name):
        W, b = params[name]
        return v @ W.T + b
    zt = jax.nn.sigmoid(linear(x, "x2h") + linear(hx, "h2h"))
    rt = jnp.tanh(linear(x, "x2r") + linear(hx, "h2r"))
    inpt_ht = jnp.tanh(linear(rt * hx, "h2n") + linear(x, "x2n"))
    return (1.0 - zt) * hx + zt * inpt_ht


if __name__ == "__main__":
    B, INPUT_SIZE, HIDDEN_SIZE, T = 8, 16, 32, 8

    key = jax.random.PRNGKey(0)
    key, kx, kh, ks = jax.random.split(key, 4)
    x = jax.random.normal(kx, (B, INPUT_SIZE), jnp.float32)
    hx = jax.random.normal(kh, (B, HIDDEN_SIZE), jnp.float32)
    xs = jax.random.normal(ks, (T, B, INPUT_SIZE), jnp.float32)

    params = init_params(key, INPUT_SIZE, HIDDEN_SIZE)
    packed = prepare_gru_params(params, INPUT_SIZE, HIDDEN_SIZE)          # f32 weights

    # Single step (module forward semantics).
    out = gru_cell(x, hx, packed)
    jax.block_until_ready(out)
    ref = gru_cell_ref(x, hx, params)
    assert out.shape == (B, HIDDEN_SIZE)
    assert jnp.allclose(out, ref, atol=1e-5, rtol=1e-5), \
        float(jnp.max(jnp.abs(out - ref)))

    # Fused sequence: hoisted x-projection + chunked recurrence, padded output.
    hs_pad = gru_sequence(xs, hx, packed, trim=False)
    jax.block_until_ready(hs_pad)
    h_ref = hx
    refs = []
    for t in range(T):
        h_ref = gru_cell_ref(xs[t], h_ref, params)
        refs.append(h_ref)
    refs = jnp.stack(refs)
    assert hs_pad.shape == (T, B, packed["Hp"])
    assert jnp.allclose(hs_pad[:, :, :HIDDEN_SIZE], refs, atol=1e-4, rtol=1e-4), \
        float(jnp.max(jnp.abs(hs_pad[:, :, :HIDDEN_SIZE] - refs)))
    assert jnp.allclose(hs_pad[:, :, HIDDEN_SIZE:], 0.0)   # padded lanes stay exactly 0

    # bf16 weights: half the weight VMEM/DMA, full-rate MXU; f32 accumulation/carry.
    packed_bf16 = prepare_gru_params(params, INPUT_SIZE, HIDDEN_SIZE,
                                     dtype=jnp.bfloat16)
    hs_bf16 = gru_sequence(xs, hx, packed_bf16, trim=False)
    jax.block_until_ready(hs_bf16)
    assert jnp.allclose(hs_bf16[:, :, :HIDDEN_SIZE], refs, atol=7.5e-2, rtol=7.5e-2), \
        float(jnp.max(jnp.abs(hs_bf16[:, :, :HIDDEN_SIZE] - refs)))

    print("KERNEL_OK")
</pallas_src>

<mosaic_0001>
module attributes {stable_mosaic.version = 11 : i64} {
  func.func @xproj_kernel(%arg0: i32, %arg1: memref<8x16xf32, #tpu.memory_space<vmem>>, %arg2: memref<16x384xf32, #tpu.memory_space<vmem>>, %arg3: memref<1x384xf32, #tpu.memory_space<vmem>>, %arg4: memref<8x384xf32, #tpu.memory_space<vmem>>) attributes {dimension_semantics = [#tpu.dimension_semantics<parallel>], iteration_bounds = array<i64: 1>, scalar_prefetch = 0 : i64, scratch_operands = 0 : i64, tpu.core_type = #tpu.core_type<tc>, window_params = [{transform_indices = @transform_0, window_bounds = array<i64: 8, 16>}, {pipeline_mode = #tpu.pipeline_mode<synchronous>, transform_indices = @transform_1, window_bounds = array<i64: 16, 384>}, {pipeline_mode = #tpu.pipeline_mode<synchronous>, transform_indices = @transform_2, window_bounds = array<i64: 1, 384>}, {transform_indices = @transform_3, window_bounds = array<i64: 8, 384>}]} {
    %c0 = arith.constant 0 : index
    %c0_0 = arith.constant 0 : index
    %0 = vector.load %arg1[%c0, %c0_0] : memref<8x16xf32, #tpu.memory_space<vmem>>, vector<8x16xf32>
    %c0_1 = arith.constant 0 : index
    %c0_2 = arith.constant 0 : index
    %1 = vector.load %arg2[%c0_1, %c0_2] : memref<16x384xf32, #tpu.memory_space<vmem>>, vector<16x384xf32>
    %cst = arith.constant dense<0.000000e+00> : vector<8x384xf32>
    %2 = tpu.matmul %0, %1, %cst {dimension_numbers = #tpu.dot_dimension_numbers<[1], [0], [0], [1], [0, 0, 1, 1], [], []>} : vector<8x16xf32>, vector<16x384xf32>, vector<8x384xf32> -> vector<8x384xf32>
    %c0_3 = arith.constant 0 : index
    %c0_4 = arith.constant 0 : index
    %3 = vector.load %arg3[%c0_3, %c0_4] : memref<1x384xf32, #tpu.memory_space<vmem>>, vector<1x384xf32>
    %4 = vector.broadcast %3 : vector<1x384xf32> to vector<8x384xf32>
    %5 = arith.addf %2, %4 : vector<8x384xf32>
    %c0_5 = arith.constant 0 : index
    %c0_6 = arith.constant 0 : index
    %6 = vector.load %arg4[%c0_5, %c0_6] : memref<8x384xf32, #tpu.memory_space<vmem>>, vector<8x384xf32>
    tpu.vector_store %arg4[%c0_5, %c0_6], %5 {strides = array<i32>} : memref<8x384xf32, #tpu.memory_space<vmem>>, vector<8x384xf32>,
    return
  }
  func.func @transform_0(%arg0: i32) -> (i32, i32) {
    %c0_i32 = arith.constant 0 : i32
    %c0_i32_0 = arith.constant 0 : i32
    return %arg0, %c0_i32 : i32, i32
  }
  func.func @transform_1(%arg0: i32) -> (i32, i32) {
    %c0_i32 = arith.constant 0 : i32
    %c0_i32_0 = arith.constant 0 : i32
    %c0_i32_1 = arith.constant 0 : i32
    return %c0_i32, %c0_i32_0 : i32, i32
  }
  func.func @transform_2(%arg0: i32) -> (i32, i32) {
    %c0_i32 = arith.constant 0 : i32
    %c0_i32_0 = arith.constant 0 : i32
    %c0_i32_1 = arith.constant 0 : i32
    return %c0_i32, %c0_i32_0 : i32, i32
  }
  func.func @transform_3(%arg0: i32) -> (i32, i32) {
    %c0_i32 = arith.constant 0 : i32
    %c0_i32_0 = arith.constant 0 : i32
    return %arg0, %c0_i32 : i32, i32
  }
}

</mosaic_0001>

<bundles_post_ra>
// kernel: tpu_custom_call.1
= control target key start
LH: loop header
LB: loop body
LE: loop exit
PB: predicated region body
PF: predicated region fallthrough
CT: control target
= control target key end

     0   :  { %8 = vsyncpa [#allocation3], 0  ;;  %s402_s0 = inlined_call_operand.hbm [shape: f32[8,16], index: 0, kind: input, shape index: {}]   ;;  %s403_s1 = inlined_call_operand.hbm [shape: f32[16,384], index: 1, kind: input, shape index: {}]   ;;  %s404_s2 = inlined_call_operand.vmem [shape: f32[1,384], index: 2, kind: input, shape index: {}]   ;;  %s405_s3 = inlined_call_operand.hbm [shape: f32[8,384], index: 3, kind: output, shape index: {}]  }
   0x1   :  { %9 = vsyncpa [#allocation6], 0 }
   0x2   :  { %10 = vsyncpa [#allocation4], 0  ;;  %s328_s12 = smov [#allocation2]   ;;  %s329_s14 = smov [#allocation5]  }
   0x3   :  { %s17_s13 = sshll.u32 %s328_s12, 4  ;;  %s26_s15 = sshll.u32 %s329_s14, 4  ;;  %s18_s13 = int_to_ptr.vmem [resolvable:$true] %s17_s13  ;;  %s356_s15 = int_to_ptr.vmem [resolvable:$true] %s26_s15 }
   0x4   :  { %s256_s18 = scalar_lea.hbm %s402_s0, 128 }
   0x5   :  { %p257_p0 = scmp.ne.s32.totalorder %s402_s0, %s256_s18  ;;  %p260_p1 = scmp.lt.u32.totalorder %s256_s18, %s402_s0 }
   0x7   :  { %p262_p2 = pnand %p260_p1, %p257_p0 }
   0x9   :  { %265 = shalt.err (!%p262_p2)
}
   0xa   :  { %s266_s23 = scalar_lea.vmem %s18_s13, 128  ;;  %p271_p4 = scmp.lt.s32.totalorder %s18_s13, %s18_s13 }
   0xb   :  { %p267_p3 = scmp.ne.s32.totalorder %s18_s13, %s266_s23  ;;  %p272_p5 = scmp.lt.s32.totalorder %s266_s23, %s266_s23 }
   0xd   :  { %p273_p6 = por %p272_p5, %p271_p4 }
   0xf   :  { %p274_p7 = pnand %p273_p6, %p267_p3 }
  0x11   :  { %277 = shalt.err (!%p274_p7)
}
  0x12   :  { %20 = dma.hbm_to_vmem [thread:$0]  %s402_s0, 128, %s18_s13, [#allocation3]  }
  0x13   :  { %s278_s28 = scalar_lea.hbm %s403_s1, 768 }
  0x14   :  { %p279_p8 = scmp.ne.s32.totalorder %s403_s1, %s278_s28  ;;  %p282_p9 = scmp.lt.u32.totalorder %s278_s28, %s403_s1 }
  0x16   :  { %p284_p10 = pnand %p282_p9, %p279_p8 }
  0x18   :  { %287 = shalt.err (!%p284_p10)
}
  0x19   :  { %s288_s6 = scalar_lea.vmem %s356_s15, 768  ;;  %p293_p12 = scmp.lt.s32.totalorder %s356_s15, %s356_s15 }
  0x1a   :  { %p289_p11 = scmp.ne.s32.totalorder %s356_s15, %s288_s6  ;;  %p294_p13 = scmp.lt.s32.totalorder %s288_s6, %s288_s6 }
  0x1c   :  { %p295_p0 = por %p294_p13, %p293_p12 }
  0x1e   :  { %p296_p1 = pnand %p295_p0, %p289_p11 }
  0x20   :  { %299 = shalt.err (!%p296_p1)
}
  0x21   :  { %s330_s0 = smov 384   ;;  %s331_s7 = smov 24  }
  0x22   :  { %32 = dma.hbm_to_vmem [thread:$0]  %s403_s1, 768, %s356_s15, [#allocation6], %s330_s0, %s330_s0, %s331_s7  }
  0x23   :  { %322 = dma.done.wait [#allocation3], 128  }
  0x24   :  { %323 = vsyncadd [#allocation3], 4294967168 }
  0x25   :  { %324 = dma.done.wait [#allocation6], 768  }
  0x26   :  { %325 = vsyncadd [#allocation6], 4294966528  ;;  %v332_v0 = vmov 0.0|0.0   ;;  %v333_v1 = vmov 0.0   ;;  %vm334_vm0 = vmmov 0   ;;  %v43_v2 = vld [vmem:[#allocation5 + $0x8] sm:$0xff]  ;;  %v50_v12 = vlaneseq }
  0x27   :  { %245 = vmatprep.subr.bf16.mxu1 %v332_v0  ;;  %133 = vmatprep.mubr.f32.mxu0 %v333_v1  ;;  %v46_v3 = vld [vmem:[#allocation5 + $0x20] sm:$0xff]  ;;  %v45_v6 = vld [vmem:[#allocation5 + $0x18] sm:$0xff]  ;;  %v44_v7 = vld [vmem:[#allocation5 + $0x10] sm:$0xff]  ;;  %vm65_vm1 = vcmask 130048   ;;  %s335_s11 = smov [#allocation7]  }
  0x28   :  { %238 = vmatprep.mubr.msk.f32.mxu1 %vm334_vm0, %v333_v1  ;;  %v42_v4 = vld [vmem:[#allocation5] sm:$0xff]  ;;  %v241_v5 = vpack.c.bf16 %v46_v3, %v43_v2  ;;  %v47_v8 = vld [vmem:[#allocation5 + $0x28] sm:$0xff]  ;;  %v41_v11 = vld [vmem:[#allocation2] sm:$0xff]  ;;  %v51_v13 = vshrl.u32 %v50_v12, 7  ;;  %s219_s12 = sshll.u32 %s335_s11, 4  ;;  %s220_s12 = int_to_ptr.vmem [resolvable:$true] %s219_s12 }
  0x29   :  { %v243_v9 = vpack.c.bf16 %v45_v6, %v42_v4  ;;  %v246_v10 = vpack.c.bf16 %v47_v8, %v44_v7  ;;  %v48_v16 = vld [vmem:[%s404_s2] sm:$0x7]  ;;  %s300_s13 = scalar_lea.vmem %s220_s12, 384  ;;  %p305_p3 = scmp.lt.s32.totalorder %s220_s12, %s220_s12 }
  0x2a   :  { %242 = vmatprep.subr.bf16.mxu0 %v241_v5  ;;  %v52_v14 = vsub.s32 0, %v51_v13  ;;  %v60_v15 = vsub.s32 2, %v51_v13  ;;  %v56_v17 = vsub.s32 1, %v51_v13  ;;  %p301_p2 = scmp.ne.s32.totalorder %s220_s12, %s300_s13  ;;  %p306_p4 = scmp.lt.s32.totalorder %s300_s13, %s300_s13 }
  0x2b   :  { %244 = vmatpush1.bf16.msra.mxu0 %v243_v9  ;;  %247 = vmatpush3.bf16.msra.mxu1 %v246_v10 }
  0x2c   :  { %v53_v18 = vrot.slane %v48_v16, %v52_v14  ;;  %v61_v19 = vrot.slane %v48_v16, %v60_v15  ;;  %v57_v20 = vrot.slane %v48_v16, %v56_v17  ;;  %p307_p5 = por %p306_p4, %p305_p3 }
  0x2e   :  { %229 = vmatmul.mubr.msk.f32.vlgmr.msra.gmra.mrb[0].mxu0 %vm65_vm1, %v41_v11  ;;  %239 = vmatmul.mubr.msk.f32.vlgmr.msra.gmra.mrb[0].mxu1 %vm65_vm1, %v41_v11  ;;  %p308_p6 = pnand %p307_p5, %p301_p2 }
 0x101   :  { %v135_v21 = vpop.f32.mrb[0].mxu0  ;;  %v206_v22 = vpop.f32.mrb[0].mxu1 }
 0x102   :  { %v136_v23 = vadd.f32 %v135_v21, %v53_v18  ;;  %v207_v24 = vadd.f32 %v206_v22, %v61_v19  ;;  %v137_v25 = vpop.f32.mrb[1].mxu0  ;;  %v240_v26 = vpop.f32.mrb[1].mxu1 }
 0x103   :  { %v138_v27 = vadd.f32 %v137_v25, %v57_v20 }
 0x104   :  { %210 = vst [vmem:[#allocation7] sm:$0xff] %v136_v23  ;;  %212 = vst [vmem:[#allocation7 + $0x10] sm:$0xff] %v207_v24 }
 0x105   :  { %211 = vst [vmem:[#allocation7 + $0x8] sm:$0xff] %v138_v27 }
 0x106   :  { %311 = shalt.err (!%p308_p6)
}
 0x107   :  { %s312_s15 = scalar_lea.hbm %s405_s3, 384 }
 0x108   :  { %p313_p7 = scmp.ne.s32.totalorder %s405_s3, %s312_s15  ;;  %p316_p8 = scmp.lt.u32.totalorder %s312_s15, %s405_s3 }
 0x10a   :  { %p318_p9 = pnand %p316_p8, %p313_p7 }
 0x10c   :  { %321 = shalt.err (!%p318_p9)
}
 0x10d   :  { %222 = dma.vmem_to_hbm [thread:$0]  %s220_s12, 384, %s405_s3, [#allocation4]  }
 0x10e   :  { %326 = dma.done.wait [#allocation4], 384  }
 0x10f   :  { %327 = vsyncadd [#allocation4], 4294966912 }
 0x110   :  { %226 = vsyncpa [#allocation3], 1 }
 0x111   :  { %227 = vsyncpa [#allocation6], 1 }
 0x112   :  { %228 = vsyncpa [#allocation4], 1 }

</bundles_post_ra>
